<compile_context>
chip_gen: v5e
topology: v5e:2x2
jax: 0.10.0
libtpu: 0.0.40
codegen_flags: <defaults>
</compile_context>

<pallas_src>
import functools

import jax
import jax.numpy as jnp
from jax import lax
from jax.experimental import pallas as pl
from jax.experimental.pallas import tpu as pltpu

_LANE = 128
_F32 = 4  # bytes per float32

# Test hook: force the multi-row-block (parallel-M) path even on 1-TC chips so
# the v7x code path is exercised by the self-test below.
_FORCE_SPLIT_M = False


# ---------------------------------------------------------------------------
# Hardware / sizing helpers.
# ---------------------------------------------------------------------------
def _vmem_capacity_bytes():
    try:
        cap = getattr(pltpu.get_tpu_info(), "vmem_capacity_bytes", None)
        if cap:
            return int(cap)
    except Exception:
        pass
    return 64 << 20  # conservative fallback (v7x per-core VMEM)


def _num_tensorcores():
    """2 for v7x-class chips (2 TensorCores / chip), else 1 (v5e / v6e)."""
    try:
        kind = getattr(jax.devices()[0], "device_kind", "").lower()
        if "v7" in kind:
            return 2
    except Exception:
        pass
    return 1


def _feature_view(x):
    """NCHW -> (M=a*b, K=c*d) f32 view (pure reshape, no pad / no copy)."""
    a, b, c, d = x.shape
    M, K = a * b, c * d
    feats = x.reshape(M, K)
    if feats.dtype != jnp.float32:
        feats = feats.astype(jnp.float32)
    return feats, M, K, 1.0 / float(a * b * c * d)


def _vmem_bytes(M, tm, tk, mtiled):
    """Rough resident VMEM footprint for one grid step (double-buffered)."""
    lhs = 2 * tm * tk * _F32                   # lhs feature blocks (f32)
    rhs = 2 * M * tk * _F32 if mtiled else 0   # full-M rhs blocks (M-tiled only)
    acc = tm * M * _F32                        # resident f32 accumulator
    tgt = 2 * tm * M * _F32                    # target / output gram blocks
    tmp = (tm + (M if mtiled else 0)) * tk * 2 + tm * M * _F32  # bf16 casts + dot temp
    return lhs + rhs + acc + tgt + tmp


def _choose_tiles(M, K):
    """Pick (tm, tk, mtiled, vmem_cap) for the K-reduction grid."""
    vmem_cap = _vmem_capacity_bytes()
    budget = int(vmem_cap * 0.75)  # ~96 MiB on v5e/v6e, ~48 MiB on v7x

    # M row-block tiling: parallel axis for 2-TC chips (v7x), or a fallback
    # when the resident (M, M) accumulator would blow the VMEM budget.
    tm = M
    want_split = (
        _FORCE_SPLIT_M
        or (_num_tensorcores() >= 2 and M >= 256)
        or M * M * _F32 > budget // 2
    )
    if want_split:
        for cand in (256, 128):
            if M % cand == 0 and M // cand >= 2:
                tm = cand
                break
    mtiled = tm != M

    # K tile: largest lane-aligned tile (<= K) that fits the VMEM budget.
    if K <= _LANE:
        return tm, K, mtiled, vmem_cap
    k_floor = (K // _LANE) * _LANE  # largest 128-multiple <= K
    tk = _LANE
    for cand in (k_floor, 8192, 4096, 2048, 1024, 512, 256, 128):
        if cand > k_floor or cand % _LANE:
            continue
        if _vmem_bytes(M, tm, cand, mtiled) <= budget:
            tk = cand
            break
    return tm, tk, mtiled, vmem_cap


def _compiler_params(semantics, needed_bytes, vmem_cap):
    limit = int(min(max(needed_bytes * 1.4 + (4 << 20), 16 << 20),
                    vmem_cap * 0.8))
    return pltpu.CompilerParams(
        dimension_semantics=semantics,
        vmem_limit_bytes=limit,
    )


# ---------------------------------------------------------------------------
# Kernel building blocks.
# ---------------------------------------------------------------------------
def _bf16_tile(feat_ref, k, tk, K, ragged):
    """Load a (rows, tk) f32 feature tile, mask the ragged K tail, cast bf16."""
    f = feat_ref[...]
    if ragged:
        cols = k * tk + lax.broadcasted_iota(jnp.int32, f.shape, 1)
        f = jnp.where(cols < K, f, 0.0)
    return f.astype(jnp.bfloat16)


def _gram_step(acc_ref, lhs, rhs):
    """acc += lhs @ rhs^T (NT form: contract the minor tk axis of both)."""
    acc_ref[...] += lax.dot_general(
        lhs, rhs,
        dimension_numbers=(((1,), (1,)), ((), ())),
        preferred_element_type=jnp.float32)


# --- gram-only kernels (used once, for the detached target gram) ------------
def _gram_kernel(feat_ref, g_ref, acc_ref, *, inv_div, K, tk, ragged):
    k = pl.program_id(0)

    @pl.when(k == 0)
    def _():
        acc_ref[...] = jnp.zeros_like(acc_ref)

    f = _bf16_tile(feat_ref, k, tk, K, ragged)
    _gram_step(acc_ref, f, f)

    @pl.when(k == pl.num_programs(0) - 1)
    def _():
        g_ref[...] = (acc_ref[...] * inv_div).astype(g_ref.dtype)


def _gram_kernel_mtiled(lhs_ref, rhs_ref, g_ref, acc_ref, *, inv_div, K, tk, ragged):
    k = pl.program_id(1)

    @pl.when(k == 0)
    def _():
        acc_ref[...] = jnp.zeros_like(acc_ref)

    _gram_step(acc_ref,
               _bf16_tile(lhs_ref, k, tk, K, ragged),
               _bf16_tile(rhs_ref, k, tk, K, ragged))

    @pl.when(k == pl.num_programs(1) - 1)
    def _():
        g_ref[...] = (acc_ref[...] * inv_div).astype(g_ref.dtype)


# --- fused gram + MSE kernels (forward pass) ---------------------------------
def _gram_mse_kernel(feat_ref, target_ref, sse_ref, acc_ref, *, inv_div, K, tk, ragged):
    k = pl.program_id(0)

    @pl.when(k == 0)
    def _():
        acc_ref[...] = jnp.zeros_like(acc_ref)

    f = _bf16_tile(feat_ref, k, tk, K, ragged)
    _gram_step(acc_ref, f, f)

    @pl.when(k == pl.num_programs(0) - 1)
    def _():
        diff = acc_ref[...] * inv_div - target_ref[...]
        sse_ref[0, 0] = jnp.sum(diff * diff)


def _gram_mse_kernel_mtiled(lhs_ref, rhs_ref, target_ref, sse_ref, acc_ref,
                            *, inv_div, K, tk, ragged):
    k = pl.program_id(1)

    @pl.when(k == 0)
    def _():
        acc_ref[...] = jnp.zeros_like(acc_ref)

    _gram_step(acc_ref,
               _bf16_tile(lhs_ref, k, tk, K, ragged),
               _bf16_tile(rhs_ref, k, tk, K, ragged))

    @pl.when(k == pl.num_programs(1) - 1)
    def _():
        diff = acc_ref[...] * inv_div - target_ref[...]
        sse_ref[0, 0] = jnp.sum(diff * diff)  # partial SSE for this row block


# ---------------------------------------------------------------------------
# Wrappers.
# ---------------------------------------------------------------------------
def gram_matrix(x):
    """x: (a, b, c, d) -> (a*b, a*b) f32 gram matrix / (a*b*c*d)."""
    feats, M, K, inv_div = _feature_view(x)
    tm, tk, mtiled, vmem_cap = _choose_tiles(M, K)
    ragged = (K % tk) != 0
    kgrid = pl.cdiv(K, tk)
    needed = _vmem_bytes(M, tm, tk, mtiled)

    if not mtiled:
        kernel = functools.partial(_gram_kernel, inv_div=inv_div, K=K, tk=tk, ragged=ragged)
        grid = (kgrid,)
        in_specs = [pl.BlockSpec((M, tk), lambda k: (0, k))]
        out_specs = pl.BlockSpec((M, M), lambda k: (0, 0))
        semantics = ("arbitrary",)
        args = (feats,)
    else:
        kernel = functools.partial(_gram_kernel_mtiled, inv_div=inv_div, K=K, tk=tk, ragged=ragged)
        grid = (M // tm, kgrid)
        in_specs = [pl.BlockSpec((tm, tk), lambda i, k: (i, k)),   # lhs row block
                    pl.BlockSpec((M, tk), lambda i, k: (0, k))]    # full-M rhs slab
        out_specs = pl.BlockSpec((tm, M), lambda i, k: (i, 0))
        semantics = ("parallel", "arbitrary")
        args = (feats, feats)

    return pl.pallas_call(
        kernel,
        out_shape=jax.ShapeDtypeStruct((M, M), jnp.float32),
        grid_spec=pltpu.PrefetchScalarGridSpec(
            num_scalar_prefetch=0,
            grid=grid,
            in_specs=in_specs,
            out_specs=out_specs,
            scratch_shapes=[pltpu.VMEM((tm, M), jnp.float32)],
        ),
        compiler_params=_compiler_params(semantics, needed, vmem_cap),
    )(*args)


def style_loss(x, target_gram):
    """mean((gram_matrix(x) - target_gram)^2), fused into one Pallas kernel."""
    feats, M, K, inv_div = _feature_view(x)
    tm, tk, mtiled, vmem_cap = _choose_tiles(M, K)
    ragged = (K % tk) != 0
    kgrid = pl.cdiv(K, tk)
    needed = _vmem_bytes(M, tm, tk, mtiled)
    target_gram = target_gram.astype(jnp.float32)

    if not mtiled:
        kernel = functools.partial(_gram_mse_kernel, inv_div=inv_div, K=K, tk=tk, ragged=ragged)
        grid = (kgrid,)
        in_specs = [pl.BlockSpec((M, tk), lambda k: (0, k)),
                    pl.BlockSpec((M, M), lambda k: (0, 0))]        # resident target
        out_shape = jax.ShapeDtypeStruct((1, 1), jnp.float32)
        out_specs = pl.BlockSpec((1, 1), lambda k: (0, 0),
                                 memory_space=pltpu.MemorySpace.SMEM)
        semantics = ("arbitrary",)
        args = (feats, target_gram)
    else:
        nblk = M // tm
        kernel = functools.partial(_gram_mse_kernel_mtiled, inv_div=inv_div, K=K, tk=tk,
                                   ragged=ragged)
        grid = (nblk, kgrid)
        in_specs = [pl.BlockSpec((tm, tk), lambda i, k: (i, k)),
                    pl.BlockSpec((M, tk), lambda i, k: (0, k)),
                    pl.BlockSpec((tm, M), lambda i, k: (i, 0))]
        out_shape = jax.ShapeDtypeStruct((nblk, 1), jnp.float32)
        # One partial SSE per (parallel) row block -> no scalar write race.
        out_specs = pl.BlockSpec((1, 1), lambda i, k: (i, 0),
                                 memory_space=pltpu.MemorySpace.SMEM)
        semantics = ("parallel", "arbitrary")
        args = (feats, feats, target_gram)

    partial_sse = pl.pallas_call(
        kernel,
        out_shape=out_shape,
        grid_spec=pltpu.PrefetchScalarGridSpec(
            num_scalar_prefetch=0,
            grid=grid,
            in_specs=in_specs,
            out_specs=out_specs,
            scratch_shapes=[pltpu.VMEM((tm, M), jnp.float32)],
        ),
        compiler_params=_compiler_params(semantics, needed, vmem_cap),
    )(*args)
    return jnp.sum(partial_sse) * (1.0 / float(M * M))


# ---------------------------------------------------------------------------
# Module-equivalent wrapper.
# ---------------------------------------------------------------------------
class StyleLoss:
    def __init__(self, target_feature):
        # Target gram is "detached": a plain constant array.
        self.target = jax.block_until_ready(gram_matrix(target_feature))
        self.loss = None

    def __call__(self, x):
        # Fused gram + MSE: single kernel launch, no gram writeback / re-read.
        self.loss = style_loss(x, self.target)
        return x  # forward returns its input unchanged (pass-through)


if __name__ == "__main__":
    key = jax.random.PRNGKey(0)
    keys = jax.random.split(key, 6)

    def gram_ref(t):
        # bf16-consistent reference: same mixed precision as the kernel
        # (bf16 MXU operands, f32 accumulation).
        a, b, c, d = t.shape
        f = t.reshape(a * b, c * d).astype(jnp.bfloat16)
        g = jnp.dot(f, f.T, preferred_element_type=jnp.float32)
        return g / float(a * b * c * d)

    def loss_ref(xx, tt):
        return jnp.mean((gram_ref(xx) - gram_ref(tt)) ** 2)

    # --- case 1: (2, 4, 16, 16), K = 256 (lane aligned), single K tile ------
    shape = (2, 4, 16, 16)
    tgt = jax.random.normal(keys[0], shape, dtype=jnp.float32)
    x = jax.random.normal(keys[1], shape, dtype=jnp.float32)
    module = StyleLoss(tgt)
    y = jax.block_until_ready(module(x))
    loss = jax.block_until_ready(module.loss)
    assert y.shape == x.shape and jnp.allclose(y, x)
    assert jnp.allclose(module.target, gram_ref(tgt), rtol=1e-4, atol=1e-6)
    assert jnp.allclose(loss, loss_ref(x, tgt), rtol=5e-3, atol=1e-7), (loss, loss_ref(x, tgt))

    # --- case 2: K = 14*14 = 196 (ragged K tail, in-kernel column mask) -----
    shape2 = (1, 8, 14, 14)
    tgt2 = jax.random.normal(keys[2], shape2, dtype=jnp.float32)
    x2 = jax.random.normal(keys[3], shape2, dtype=jnp.float32)
    module2 = StyleLoss(tgt2)
    y2 = jax.block_until_ready(module2(x2))
    loss2 = jax.block_until_ready(module2.loss)
    assert jnp.allclose(y2, x2)
    assert jnp.allclose(loss2, loss_ref(x2, tgt2), rtol=5e-3, atol=1e-7), (loss2, loss_ref(x2, tgt2))

    # --- case 3: force the parallel-M (v7x two-TensorCore) code path --------
    shape3 = (1, 256, 16, 16)  # M = 256, K = 256
    tgt3 = jax.random.normal(keys[4], shape3, dtype=jnp.float32)
    x3 = jax.random.normal(keys[5], shape3, dtype=jnp.float32)
    _FORCE_SPLIT_M = True
    module3 = StyleLoss(tgt3)
    y3 = jax.block_until_ready(module3(x3))
    loss3 = jax.block_until_ready(module3.loss)
    _FORCE_SPLIT_M = False
    assert jnp.allclose(y3, x3)
    assert jnp.allclose(module3.target, gram_ref(tgt3), rtol=1e-4, atol=1e-6)
    assert jnp.allclose(loss3, loss_ref(x3, tgt3), rtol=5e-3, atol=1e-9), (loss3, loss_ref(x3, tgt3))

    print("KERNEL_OK")
</pallas_src>

<mosaic_0001>
module attributes {stable_mosaic.version = 11 : i64} {
  func.func @_gram_kernel(%arg0: i32, %arg1: memref<8x256xf32, #tpu.memory_space<vmem>>, %arg2: memref<8x8xf32, #tpu.memory_space<vmem>>, %arg3: memref<8x8xf32, #tpu.memory_space<vmem>>) attributes {dimension_semantics = [#tpu.dimension_semantics<arbitrary>], iteration_bounds = array<i64: 1>, scalar_prefetch = 0 : i64, scratch_operands = 1 : i64, tpu.core_type = #tpu.core_type<tc>, window_params = [{transform_indices = @transform_0, window_bounds = array<i64: 8, 256>}, {pipeline_mode = #tpu.pipeline_mode<synchronous>, transform_indices = @transform_1, window_bounds = array<i64: 8, 8>}]} {
    %c0_i32 = arith.constant 0 : i32
    %0 = arith.cmpi eq, %arg0, %c0_i32 : i32
    %1 = arith.extui %0 : i1 to i32
    %c0_i32_0 = arith.constant 0 : i32
    %2 = arith.cmpi ne, %1, %c0_i32_0 : i32
    scf.if %2 {
      %cst_8 = arith.constant 0.000000e+00 : f32
      %12 = vector.broadcast %cst_8 : f32 to vector<8x8xf32>
      %c0_9 = arith.constant 0 : index
      %c0_10 = arith.constant 0 : index
      %13 = vector.load %arg3[%c0_9, %c0_10] : memref<8x8xf32, #tpu.memory_space<vmem>>, vector<8x8xf32>
      tpu.vector_store %arg3[%c0_9, %c0_10], %12 {strides = array<i32>} : memref<8x8xf32, #tpu.memory_space<vmem>>, vector<8x8xf32>,
    } else {
    }
    %c0 = arith.constant 0 : index
    %c0_1 = arith.constant 0 : index
    %3 = vector.load %arg1[%c0, %c0_1] : memref<8x256xf32, #tpu.memory_space<vmem>>, vector<8x256xf32>
    %4 = arith.truncf %3 : vector<8x256xf32> to vector<8x256xbf16>
    %c0_2 = arith.constant 0 : index
    %c0_3 = arith.constant 0 : index
    %5 = vector.load %arg3[%c0_2, %c0_3] : memref<8x8xf32, #tpu.memory_space<vmem>>, vector<8x8xf32>
    %cst = arith.constant dense<0.000000e+00> : vector<8x8xf32>
    %6 = tpu.matmul %4, %4, %cst {dimension_numbers = #tpu.dot_dimension_numbers<[1], [1], [0], [0], [0, 0, 1, 0], [], []>} : vector<8x256xbf16>, vector<8x256xbf16>, vector<8x8xf32> -> vector<8x8xf32>
    %7 = arith.addf %5, %6 : vector<8x8xf32>
    %c0_4 = arith.constant 0 : index
    %c0_5 = arith.constant 0 : index
    %8 = vector.load %arg3[%c0_4, %c0_5] : memref<8x8xf32, #tpu.memory_space<vmem>>, vector<8x8xf32>
    tpu.vector_store %arg3[%c0_4, %c0_5], %7 {strides = array<i32>} : memref<8x8xf32, #tpu.memory_space<vmem>>, vector<8x8xf32>,
    %c0_i32_6 = arith.constant 0 : i32
    %9 = arith.cmpi eq, %arg0, %c0_i32_6 : i32
    %10 = arith.extui %9 : i1 to i32
    %c0_i32_7 = arith.constant 0 : i32
    %11 = arith.cmpi ne, %10, %c0_i32_7 : i32
    scf.if %11 {
      %c0_8 = arith.constant 0 : index
      %c0_9 = arith.constant 0 : index
      %12 = vector.load %arg3[%c0_8, %c0_9] : memref<8x8xf32, #tpu.memory_space<vmem>>, vector<8x8xf32>
      %cst_10 = arith.constant 4.8828125E-4 : f32
      %13 = vector.broadcast %cst_10 : f32 to vector<8x8xf32>
      %14 = arith.mulf %12, %13 : vector<8x8xf32>
      %c0_11 = arith.constant 0 : index
      %c0_12 = arith.constant 0 : index
      %15 = vector.load %arg2[%c0_11, %c0_12] : memref<8x8xf32, #tpu.memory_space<vmem>>, vector<8x8xf32>
      tpu.vector_store %arg2[%c0_11, %c0_12], %14 {strides = array<i32>} : memref<8x8xf32, #tpu.memory_space<vmem>>, vector<8x8xf32>,
    } else {
    }
    return
  }
  func.func @transform_0(%arg0: i32) -> (i32, i32) {
    %c0_i32 = arith.constant 0 : i32
    %c0_i32_0 = arith.constant 0 : i32
    return %c0_i32, %arg0 : i32, i32
  }
  func.func @transform_1(%arg0: i32) -> (i32, i32) {
    %c0_i32 = arith.constant 0 : i32
    %c0_i32_0 = arith.constant 0 : i32
    %c0_i32_1 = arith.constant 0 : i32
    return %c0_i32, %c0_i32_0 : i32, i32
  }
}

</mosaic_0001>

<bundles_post_ra>
// kernel: tpu_custom_call.1
= control target key start
LH: loop header
LB: loop body
LE: loop exit
PB: predicated region body
PF: predicated region fallthrough
CT: control target
= control target key end

     0   :  { %6 = vsyncpa [#allocation4], 0  ;;  %s164_s0 = inlined_call_operand.hbm [shape: f32[8,256], index: 0, kind: input, shape index: {}]   ;;  %s165_s1 = inlined_call_operand.hbm [shape: f32[8,8], index: 1, kind: output, shape index: {}]  }
   0x1   :  { %7 = vsyncpa [#allocation5], 0  ;;  %s13_s8 = sshll.u32 %s164_s0, 4  ;;  %s142_s9 = smov [#allocation3]   ;;  %s14_s8 = int_to_ptr.hbm [resolvable:$true] %s13_s8 }
   0x2   :  { %s15_s10 = sshll.u32 %s142_s9, 4  ;;  %s16_s10 = int_to_ptr.vmem [resolvable:$true] %s15_s10 }
   0x3   :  { %18 = dma.hbm_to_vmem [thread:$0]  %s14_s8, 256, %s16_s10, [#allocation4]  }
   0x4   :  { %138 = dma.done.wait [#allocation4], 256  }
   0x5   :  { %139 = vsyncadd [#allocation4], 4294967040  ;;  %v30_v0 = vld [vmem:[#allocation3] sm:$0xff]  ;;  %v31_v1 = vld [vmem:[#allocation3 + $0x8] sm:$0xff]  ;;  %vm28_vm0 = vcmask 64512   ;;  %v143_v4 = vmov 0.0  }
   0x6   :  { %v32_v2 = vpack.c.bf16 %v30_v0, %v30_v0  ;;  %v33_v3 = vpack.c.bf16 %v31_v1, %v31_v1  ;;  %29 = vst.msk [vmem:[#allocation2] sm:$0xff] %vm28_vm0, %v143_v4  ;;  %s144_s0 = smov [#allocation6]   ;;  %s77_s14 = sshll.u32 %s165_s1, 4  ;;  %s78_s14 = int_to_ptr.hbm [resolvable:$true] %s77_s14 }
   0x7   :  { %s75_s11 = sshll.u32 %s144_s0, 4  ;;  %s76_s11 = int_to_ptr.vmem [resolvable:$true] %s75_s11 }
   0x8   :  { %42 = vmatpush.bf16.xpose.msra.mxu0 %v32_v2  ;;  %55 = vmatpush.bf16.xpose.msra.mxu1 %v33_v3 }
   0xd   :  { %v34_v6 = vld [vmem:[#allocation2] sm:$0xff] }
   0xf   :  { %43 = vmatmul.bf16.vlgmr.msra.gmra.mxu0 %v32_v2  ;;  %56 = vmatmul.bf16.vlgmr.msra.gmra.mxu1 %v33_v3 }
  0x8c   :  { %v44_v5 = vpop.f32.mrf.mxu0  ;;  %v57_v7 = vpop.f32.mrf.mxu1 }
  0x8d   :  { %v58_v8 = vadd.f32 %v57_v7, %v44_v5 }
  0x8f   :  { %v61_v9 = vadd.f32 %v58_v8, %v34_v6 }
  0x91   :  { %63 = vst.msk [vmem:[#allocation2] sm:$0xff] %vm28_vm0, %v61_v9 }
  0x94   :  { %v46_v10 = vpop.f32.mrf.mxu0  ;;  %v59_v11 = vpop.f32.mrf.mxu1 }
  0x98   :  { %v67_v12 = vld [vmem:[#allocation2] sm:$0xff] }
  0x99   :  { %v68_v13 = vmul.f32 0.00048828125, %v67_v12 }
  0x9b   :  { %69 = vst.msk [vmem:[#allocation6] sm:$0xff] %vm28_vm0, %v68_v13 }
  0x9c   :  { %80 = dma.vmem_to_hbm [thread:$0]  %s76_s11, 128, %s78_s14, [#allocation5]  }
  0x9d   :  { %140 = dma.done.wait [#allocation5], 128  }
  0x9e   :  { %141 = vsyncadd [#allocation5], 4294967168 }
  0x9f   :  { %85 = vsyncpa [#allocation4], 1 }
  0xa0   :  { %86 = vsyncpa [#allocation5], 1 }

</bundles_post_ra>
